<compile_context>
chip_gen: v7x
topology: tpu7x:2x2x1
jax: 0.10.0
libtpu: 0.0.40
codegen_flags: <defaults>
</compile_context>

<pallas_src>
import jax
import jax.numpy as jnp
from jax.experimental import pallas as pl
from jax.experimental.pallas import tpu as pltpu


def _smo_kernel(w_ref, data_ref, o_ref):
    # w_ref:    (1, dim)   domain_fnc(r) weights, resident every grid step
    # data_ref: (dim, TN)  one lane-tile of data, streamed from HBM
    # o_ref:    (1, TN)    corresponding output tile
    o_ref[...] = jnp.dot(
        w_ref[...], data_ref[...],
        preferred_element_type=jnp.float32,
    ).astype(o_ref.dtype)


def _round_up(x, m):
    return ((x + m - 1) // m) * m


def _round_down_128(x):
    return max(128, (x // 128) * 128)


def _vmem_capacity_bytes():
    """Physical VMEM per TensorCore; conservative fallback if query fails."""
    try:
        return int(pltpu.get_tpu_info().vmem_capacity_bytes)
    except Exception:
        return 64 << 20  # v7x-sized (smallest of the three generations)


def _choose_tn(dim, n, itemsize, data_budget_bytes):
    """Lane tile: ~8 MiB of data per tile (multiple of 128 lanes), bounded by
    the double-buffer budget and by the (128-rounded) problem width."""
    n_pad = _round_up(n, 128)
    tile_target = 8 << 20                                   # ~8 MiB per data tile
    tn = _round_down_128(tile_target // (dim * itemsize))
    tn_budget = _round_down_128(data_budget_bytes // (2 * dim * itemsize))
    return min(tn, tn_budget, n_pad)


def smo_forward(r, data, *, tn=None):
    """Pallas implementation of SMOModel.forward with domain_fnc = softmax.

    r:    (dim,)   float32 parameter
    data: (dim, N) float32 or bfloat16 (bf16 halves HBM traffic; f32 accumulate)
    returns: (N,) float32
    """
    dim, n = data.shape
    assert r.shape == (dim,)
    itemsize = jnp.dtype(data.dtype).itemsize

    # domain_fnc (softmax) hoisted to the wrapper: O(dim), computed once.
    w = jax.nn.softmax(r.astype(jnp.float32)).astype(data.dtype).reshape(1, dim)

    vmem_cap = _vmem_capacity_bytes()
    # Data double-buffer budget: ~21 MiB on v7x (64 MiB VMEM), ~42 MiB on
    # v5e/v6e (128 MiB VMEM), capped at 48 MiB.
    data_budget = min(max(vmem_cap // 3, 16 << 20), 48 << 20)

    if tn is None:
        tn = _choose_tn(dim, n, itemsize, data_budget)
    assert tn % 128 == 0

    grid_n = pl.cdiv(n, tn)

    # Explicit VMEM limit: double-buffered data + output + weights, with
    # margin, capped at 3/4 of physical VMEM (48 MiB on v7x, 96 MiB on
    # v5e/v6e).  Always set: v5e's scoped default is only 16 MiB.
    data_bytes = 2 * dim * tn * itemsize
    out_bytes = 2 * 8 * tn * 4                           # (1, tn) pads to 8 sublanes
    w_bytes = 2 * 8 * _round_up(dim, 128) * itemsize
    vmem_limit = min(
        max(int(1.5 * (data_bytes + out_bytes + w_bytes)) + (2 << 20), 32 << 20),
        (3 * vmem_cap) // 4,
    )

    out = pl.pallas_call(
        _smo_kernel,
        out_shape=jax.ShapeDtypeStruct((1, n), jnp.float32),
        grid_spec=pltpu.PrefetchScalarGridSpec(
            num_scalar_prefetch=0,
            grid=(grid_n,),
            in_specs=[
                pl.BlockSpec((1, dim), lambda j: (0, 0)),    # weights: full, resident
                pl.BlockSpec((dim, tn), lambda j: (0, j)),   # data: lane tile j (last tile ragged)
            ],
            out_specs=pl.BlockSpec((1, tn), lambda j: (0, j)),
        ),
        compiler_params=pltpu.CompilerParams(
            dimension_semantics=("parallel",),
            vmem_limit_bytes=vmem_limit,
        ),
    )(w, data)

    return out[0]


if __name__ == "__main__":
    key = jax.random.PRNGKey(0)
    k_r, k_d = jax.random.split(key)

    dim = 32           # number of "domain" components (leading axis of data)
    N = 1000           # number of attributes (exercises the ragged final tile)

    # Deterministic parameter init matching torch.normal(zeros(dim), 2/dim)
    r = jax.random.normal(k_r, (dim,), dtype=jnp.float32) * (2.0 / dim)
    data = jax.random.normal(k_d, (dim, N), dtype=jnp.float32)

    pred = smo_forward(r, data)
    pred = jax.block_until_ready(pred)

    # Pure-JAX reference of the PyTorch forward (domain_fnc = softmax)
    w_ref = jax.nn.softmax(r)
    ref = jnp.sum(w_ref[:, None] * data, axis=0)

    assert pred.shape == (N,)
    assert jnp.allclose(pred, ref, atol=1e-5, rtol=1e-5), (
        float(jnp.max(jnp.abs(pred - ref)))
    )
    print("KERNEL_OK")
</pallas_src>

<mosaic_0001>
module attributes {stable_mosaic.version = 11 : i64} {
  func.func @_smo_kernel(%arg0: i32, %arg1: memref<1x32xf32, #tpu.memory_space<vmem>>, %arg2: memref<32x1024xf32, #tpu.memory_space<vmem>>, %arg3: memref<1x1024xf32, #tpu.memory_space<vmem>>) attributes {dimension_semantics = [#tpu.dimension_semantics<parallel>], iteration_bounds = array<i64: 1>, scalar_prefetch = 0 : i64, scratch_operands = 0 : i64, tpu.core_type = #tpu.core_type<tc>, window_params = [{pipeline_mode = #tpu.pipeline_mode<synchronous>, transform_indices = @transform_0, window_bounds = array<i64: 1, 32>}, {transform_indices = @transform_1, window_bounds = array<i64: 32, 1024>}, {transform_indices = @transform_2, window_bounds = array<i64: 1, 1024>}]} {
    %c0 = arith.constant 0 : index
    %c0_0 = arith.constant 0 : index
    %0 = vector.load %arg1[%c0, %c0_0] : memref<1x32xf32, #tpu.memory_space<vmem>>, vector<1x32xf32>
    %c0_1 = arith.constant 0 : index
    %c0_2 = arith.constant 0 : index
    %1 = vector.load %arg2[%c0_1, %c0_2] : memref<32x1024xf32, #tpu.memory_space<vmem>>, vector<32x1024xf32>
    %cst = arith.constant dense<0.000000e+00> : vector<1x1024xf32>
    %2 = tpu.matmul %0, %1, %cst {dimension_numbers = #tpu.dot_dimension_numbers<[1], [0], [0], [1], [0, 0, 1, 1], [], []>} : vector<1x32xf32>, vector<32x1024xf32>, vector<1x1024xf32> -> vector<1x1024xf32>
    %c0_3 = arith.constant 0 : index
    %c0_4 = arith.constant 0 : index
    %3 = vector.load %arg3[%c0_3, %c0_4] : memref<1x1024xf32, #tpu.memory_space<vmem>>, vector<1x1024xf32>
    tpu.vector_store %arg3[%c0_3, %c0_4], %2 {strides = array<i32>} : memref<1x1024xf32, #tpu.memory_space<vmem>>, vector<1x1024xf32>,
    return
  }
  func.func @transform_0(%arg0: i32) -> (i32, i32) {
    %c0_i32 = arith.constant 0 : i32
    %c0_i32_0 = arith.constant 0 : i32
    %c0_i32_1 = arith.constant 0 : i32
    return %c0_i32, %c0_i32_0 : i32, i32
  }
  func.func @transform_1(%arg0: i32) -> (i32, i32) {
    %c0_i32 = arith.constant 0 : i32
    %c0_i32_0 = arith.constant 0 : i32
    return %c0_i32, %arg0 : i32, i32
  }
  func.func @transform_2(%arg0: i32) -> (i32, i32) {
    %c0_i32 = arith.constant 0 : i32
    %c0_i32_0 = arith.constant 0 : i32
    return %c0_i32, %arg0 : i32, i32
  }
}

</mosaic_0001>

<bundles_post_ra>
// kernel: tpu_custom_call.1
= control target key start
LH: loop header
LB: loop body
LE: loop exit
PB: predicated region body
PF: predicated region fallthrough
CT: control target
= control target key end

     0   :  { %7 = vsyncpa [#allocation3], 0  ;;  %s622_s0 = inlined_call_operand.hbm [shape: f32[1,32], index: 0, kind: input, shape index: {}]   ;;  %s623_s1 = inlined_call_operand.hbm [shape: f32[32,1000], index: 1, kind: input, shape index: {}]   ;;  %s624_s2 = inlined_call_operand.hbm [shape: f32[1,1000], index: 2, kind: output, shape index: {}]  }
   0x1   :  { %8 = vsyncpa [#allocation6], 0 }
   0x2   :  { %9 = vsyncpa [#allocation4], 0  ;;  %s549_s9 = smov [#allocation2]   ;;  %s550_s11 = smov [#allocation5]  }
   0x3   :  { %s16_s10 = sshll.u32 %s549_s9, 4  ;;  %s25_s12 = sshll.u32 %s550_s11, 4  ;;  %s17_s10 = int_to_ptr.vmem [resolvable:$true] %s16_s10  ;;  %s571_s12 = int_to_ptr.vmem [resolvable:$true] %s25_s12 }
   0x4   :  { %s477_s15 = scalar_lea.hbm %s622_s0, 16 }
   0x5   :  { %p478_p0 = scmp.ne.s32.totalorder %s622_s0, %s477_s15  ;;  %p481_p1 = scmp.lt.u32.totalorder %s477_s15, %s622_s0 }
   0x7   :  { %p483_p2 = pnand %p481_p1, %p478_p0 }
   0x9   :  { %486 = shalt.err (!%p483_p2)
}
   0xa   :  { %s487_s20 = scalar_lea.vmem %s17_s10, 16  ;;  %s491_s21 = scalar_lea.vmem %s17_s10, 32 }
   0xb   :  { %p488_p3 = scmp.ne.s32.totalorder %s17_s10, %s487_s20  ;;  %p492_p4 = scmp.lt.s32.totalorder %s17_s10, %s17_s10 }
   0xc   :  { %p493_p5 = scmp.lt.s32.totalorder %s491_s21, %s487_s20 }
   0xe   :  { %p494_p6 = por %p493_p5, %p492_p4 }
  0x10   :  { %p495_p7 = pnand %p494_p6, %p488_p3 }
  0x12   :  { %498 = shalt.err (!%p495_p7)
}
  0x13   :  { %19 = dma.hbm_to_vmem [thread:$0]  %s622_s0, 16, %s17_s10, [#allocation3]  }
  0x14   :  { %s499_s26 = scalar_lea.hbm %s623_s1, 4096 }
  0x15   :  { %p500_p8 = scmp.ne.s32.totalorder %s623_s1, %s499_s26  ;;  %p503_p9 = scmp.lt.u32.totalorder %s499_s26, %s623_s1 }
  0x17   :  { %p505_p10 = pnand %p503_p9, %p500_p8 }
  0x19   :  { %508 = shalt.err (!%p505_p10)
}
  0x1a   :  { %s509_s3 = scalar_lea.vmem %s571_s12, 4096  ;;  %p514_p12 = scmp.lt.s32.totalorder %s571_s12, %s571_s12 }
  0x1b   :  { %p510_p11 = scmp.ne.s32.totalorder %s571_s12, %s509_s3  ;;  %p515_p13 = scmp.lt.s32.totalorder %s509_s3, %s509_s3 }
  0x1d   :  { %p516_p0 = por %p515_p13, %p514_p12 }
  0x1f   :  { %p517_p1 = pnand %p516_p0, %p510_p11 }
  0x21   :  { %520 = shalt.err (!%p517_p1)
}
  0x22   :  { %s551_s0 = smov 1024   ;;  %s552_s4 = smov 64  }
  0x23   :  { %31 = dma.hbm_to_vmem [thread:$0]  %s623_s1, 4096, %s571_s12, [#allocation6], %s551_s0, %s551_s0, %s552_s4  }
  0x24   :  { %543 = dma.done.wait [#allocation3], 16  }
  0x25   :  { %544 = vsyncadd [#allocation3], 4294967280 }
  0x26   :  { %545 = dma.done.wait [#allocation6], 4096  }
  0x27   :  { %546 = vsyncadd [#allocation6], 4294963200  ;;  %v553_v0 = vmov 0.0   ;;  %v40_v1 = vld [vmem:[#allocation5 + $0x8] sm:$0xff]  ;;  %v42_v3 = vld [vmem:[#allocation5 + $0x18] sm:$0xff]  ;;  %vm71_vm0 = vcmask 261120   ;;  %v374_v52 = vlaneseq }
  0x28   :  { %139 = vmatprep.mubr.f32.mxu0 %v553_v0  ;;  %210 = vmatprep.mubr.f32.mxu1 %v553_v0  ;;  %v48_v2 = vld [vmem:[#allocation5 + $0x48] sm:$0xff]  ;;  %v50_v5 = vld [vmem:[#allocation5 + $0x58] sm:$0xff]  ;;  %v39_v6 = vld [vmem:[#allocation5] sm:$0xff]  ;;  %v554_v50 = vmov 1966171168   ;;  %s555_s1 = smov [#allocation7]  }
  0x29   :  { %v438_v4 = vpack.c.bf16 %v48_v2, %v40_v1  ;;  %v47_v7 = vld [vmem:[#allocation5 + $0x40] sm:$0xff]  ;;  %v446_v8 = vpack.c.bf16 %v50_v5, %v42_v3  ;;  %v41_v10 = vld [vmem:[#allocation5 + $0x10] sm:$0xff]  ;;  %v56_v12 = vld [vmem:[#allocation5 + $0x88] sm:$0xff]  ;;  %v372_v51 = vunpack.c.l.s4 %v554_v50  ;;  %v375_v54 = vshrl.u32 %v374_v52, 7  ;;  %s424_s7 = sshll.u32 %s555_s1, 4  ;;  %s425_s7 = int_to_ptr.vmem [resolvable:$true] %s424_s7 }
  0x2a   :  { %v440_v9 = vpack.c.bf16 %v47_v7, %v39_v6  ;;  %v49_v11 = vld [vmem:[#allocation5 + $0x50] sm:$0xff]  ;;  %v64_v14 = vld [vmem:[#allocation5 + $0xc8] sm:$0xff]  ;;  %v58_v15 = vld [vmem:[#allocation5 + $0x98] sm:$0xff]  ;;  %s521_s8 = scalar_lea.vmem %s425_s7, 128  ;;  %p526_p3 = scmp.lt.s32.totalorder %s425_s7, %s425_s7 }
  0x2b   :  { %439 = vmatprep.subr.bf16.mxu0 %v438_v4  ;;  %v448_v13 = vpack.c.bf16 %v49_v11, %v41_v10  ;;  %v66_v16 = vld [vmem:[#allocation5 + $0xd8] sm:$0xff]  ;;  %447 = vmatprep.subr.bf16.mxu1 %v446_v8  ;;  %v442_v17 = vpack.c.bf16 %v64_v14, %v56_v12  ;;  %v55_v19 = vld [vmem:[#allocation5 + $0x80] sm:$0xff]  ;;  %v57_v21 = vld [vmem:[#allocation5 + $0x90] sm:$0xff]  ;;  %v373_v53 = vunpack.c.0.s8 %v372_v51  ;;  %p522_p2 = scmp.ne.s32.totalorder %s425_s7, %s521_s8  ;;  %p527_p4 = scmp.lt.s32.totalorder %s521_s8, %s521_s8 }
  0x2c   :  { %441 = vmatpush1.bf16.msra.mxu0 %v440_v9  ;;  %v450_v18 = vpack.c.bf16 %v66_v16, %v58_v15  ;;  %v63_v20 = vld [vmem:[#allocation5 + $0xc0] sm:$0xff]  ;;  %v65_v23 = vld [vmem:[#allocation5 + $0xd0] sm:$0xff]  ;;  %v44_v24 = vld [vmem:[#allocation5 + $0x28] sm:$0xff] }
  0x2d   :  { %449 = vmatpush1.bf16.msra.mxu1 %v448_v13  ;;  %v444_v22 = vpack.c.bf16 %v63_v20, %v55_v19  ;;  %443 = vmatprep.subr.bf16.mxu0 %v442_v17  ;;  %v452_v25 = vpack.c.bf16 %v65_v23, %v57_v21  ;;  %v38_v26 = vld [vmem:[#allocation2] sm:$0x1]  ;;  %v52_v27 = vld [vmem:[#allocation5 + $0x68] sm:$0xff]  ;;  %v43_v32 = vld [vmem:[#allocation5 + $0x20] sm:$0xff]  ;;  %v376_v56 = vsub.s32 %v373_v53, %v375_v54  ;;  %p528_p5 = por %p527_p4, %p526_p3 }
  0x2e   :  { %451 = vmatprep.subr.bf16.mxu1 %v450_v18  ;;  %v46_v28 = vld [vmem:[#allocation5 + $0x38] sm:$0xff]  ;;  %v454_v30 = vpack.c.bf16 %v52_v27, %v44_v24  ;;  %v51_v33 = vld [vmem:[#allocation5 + $0x60] sm:$0xff]  ;;  %v45_v34 = vld [vmem:[#allocation5 + $0x30] sm:$0xff] }
  0x2f   :  { %v54_v29 = vld [vmem:[#allocation5 + $0x78] sm:$0xff]  ;;  %v456_v35 = vpack.c.bf16 %v51_v33, %v43_v32  ;;  %v53_v36 = vld [vmem:[#allocation5 + $0x70] sm:$0xff]  ;;  %v60_v37 = vld [vmem:[#allocation5 + $0xa8] sm:$0xff]  ;;  %p529_p6 = pnand %p528_p5, %p522_p2 }
  0x30   :  { %v462_v31 = vpack.c.bf16 %v54_v29, %v46_v28  ;;  %445 = vmatpush1.bf16.msra.mxu0 %v444_v22  ;;  %v68_v38 = vld [vmem:[#allocation5 + $0xe8] sm:$0xff]  ;;  %v464_v39 = vpack.c.bf16 %v53_v36, %v45_v34  ;;  %v62_v41 = vld [vmem:[#allocation5 + $0xb8] sm:$0xff]  ;;  %v59_v43 = vld [vmem:[#allocation5 + $0xa0] sm:$0xff] }
  0x31   :  { %453 = vmatpush1.bf16.msra.mxu1 %v452_v25  ;;  %455 = vmatprep.subr.bf16.mxu0 %v454_v30  ;;  %v458_v40 = vpack.c.bf16 %v68_v38, %v60_v37  ;;  %v70_v42 = vld [vmem:[#allocation5 + $0xf8] sm:$0xff]  ;;  %v67_v45 = vld [vmem:[#allocation5 + $0xe0] sm:$0xff]  ;;  %v61_v46 = vld [vmem:[#allocation5 + $0xb0] sm:$0xff] }
  0x32   :  { %463 = vmatprep.subr.bf16.mxu1 %v462_v31  ;;  %v466_v44 = vpack.c.bf16 %v70_v42, %v62_v41  ;;  %v69_v47 = vld [vmem:[#allocation5 + $0xf0] sm:$0xff]  ;;  %v460_v48 = vpack.c.bf16 %v67_v45, %v59_v43 }
  0x33   :  { %434 = vmatmul.mubr.msk.f32.vlgmr.msra.gmra.mrb[0].mxu0 %vm71_vm0, %v38_v26  ;;  %v468_v49 = vpack.c.bf16 %v69_v47, %v61_v46 }
  0x34   :  { %435 = vmatmul.mubr.msk.f32.vlgmr.msra.gmra.mrb[0].mxu1 %vm71_vm0, %v38_v26  ;;  %457 = vmatpush1.bf16.msra.mxu0 %v456_v35 }
  0x35   :  { %465 = vmatpush1.bf16.msra.mxu1 %v464_v39  ;;  %459 = vmatprep.subr.bf16.mxu0 %v458_v40 }
  0x36   :  { %467 = vmatprep.subr.bf16.mxu1 %v466_v44  ;;  %281 = vmatprep.mubr.f32.mxu0 %v553_v0 }
  0x37   :  { %352 = vmatprep.mubr.f32.mxu1 %v553_v0 }
  0x38   :  { %461 = vmatpush1.bf16.msra.mxu0 %v460_v48 }
  0x39   :  { %469 = vmatpush1.bf16.msra.mxu1 %v468_v49 }
  0x3b   :  { %436 = vmatmul.mubr.msk.f32.vlgmr.msra.gmra.mrb[2].mxu0 %vm71_vm0, %v38_v26 }
  0x3c   :  { %437 = vmatmul.mubr.msk.f32.vlgmr.msra.gmra.mrb[2].mxu1 %vm71_vm0, %v38_v26 }
 0x106   :  { %v141_v55 = vpop.f32.mrb[0].mxu0 }
 0x107   :  { %v212_v57 = vpop.f32.mrb[0].mxu1  ;;  %v143_v58 = vpop.f32.mrb[1].mxu0 }
 0x108   :  { %v367_v59 = vcombine.low %v141_v55, %v143_v58  ;;  %v214_v60 = vpop.f32.mrb[1].mxu1 }
 0x109   :  { %v368_v61 = vcombine.low %v212_v57, %v214_v60 }
 0x10a   :  { %v377_v62 = vrot.slane %v367_v59, %v376_v56 }
 0x10b   :  { %v384_v63 = vrot.slane %v368_v61, %v376_v56 }
 0x10d   :  { %v399_v0 = vcombine.low %v377_v62, %v384_v63 }
 0x10e   :  { %v283_v1 = vpop.f32.mrb[2].mxu0 }
 0x10f   :  { %v354_v2 = vpop.f32.mrb[2].mxu1  ;;  %v285_v3 = vpop.f32.mrb[3].mxu0  ;;  %v407_v10 = vrot.slane %v399_v0, %v376_v56 }
 0x110   :  { %v369_v4 = vcombine.low %v283_v1, %v285_v3  ;;  %v356_v5 = vpop.f32.mrb[3].mxu1 }
 0x111   :  { %v370_v6 = vcombine.low %v354_v2, %v356_v5 }
 0x112   :  { %v391_v7 = vrot.slane %v369_v4, %v376_v56 }
 0x113   :  { %v398_v8 = vrot.slane %v370_v6, %v376_v56 }
 0x115   :  { %v400_v9 = vcombine.low %v391_v7, %v398_v8 }
 0x117   :  { %v414_v11 = vrot.slane %v400_v9, %v376_v56 }
 0x119   :  { %v415_v12 = vcombine.low %v407_v10, %v414_v11 }
 0x11b   :  { %417 = vst [vmem:[#allocation7] sm:$0xff] %v415_v12 }
 0x11c   :  { %532 = shalt.err (!%p529_p6)
}
 0x11d   :  { %s533_s11 = scalar_lea.hbm %s624_s2, 128 }
 0x11e   :  { %p534_p7 = scmp.ne.s32.totalorder %s624_s2, %s533_s11  ;;  %p537_p8 = scmp.lt.u32.totalorder %s533_s11, %s624_s2 }
 0x120   :  { %p539_p9 = pnand %p537_p8, %p534_p7 }
 0x122   :  { %542 = shalt.err (!%p539_p9)
}
 0x123   :  { %427 = dma.vmem_to_hbm [thread:$0]  %s425_s7, 128, %s624_s2, [#allocation4]  }
 0x124   :  { %547 = dma.done.wait [#allocation4], 128  }
 0x125   :  { %548 = vsyncadd [#allocation4], 4294967168 }
 0x126   :  { %431 = vsyncpa [#allocation3], 1 }
 0x127   :  { %432 = vsyncpa [#allocation6], 1 }
 0x128   :  { %433 = vsyncpa [#allocation4], 1 }

</bundles_post_ra>
